<compile_context>
chip_gen: v5e
topology: v5e:2x2
jax: 0.10.0
libtpu: 0.0.40
codegen_flags: <defaults>
</compile_context>

<pallas_src>
import functools
import math

import jax
import jax.numpy as jnp
import numpy as np
from jax.experimental import pallas as pl
from jax.experimental.pallas import tpu as pltpu


_NEG_BIG = -10000.0  # masking constant used by the PyTorch module
_KILL = -1e9         # kill value for out-of-range (ragged) key columns


def _flash_cross_attn_kernel(
        # scalar prefetch
        sk_ref,                 # SMEM (B,) int32: valid keys per batch
        # inputs
        q_ref,                  # (1, block_q, H*D)
        kv_ref,                 # (1, block_k, 2*Hk*D)
        *rest,                  # [bias_ref (1,1,block_k)], o_ref, qs, m, l, acc
        scale, causal, has_bias, use_bf16_exp, exact_recip,
        num_heads, num_kv_heads, head_dim,
        seq_q, seq_k, block_q, block_k):
    if has_bias:
        bias_ref, o_ref, qs_ref, m_ref, l_ref, acc_ref = rest
    else:
        o_ref, qs_ref, m_ref, l_ref, acc_ref = rest
        bias_ref = None

    b = pl.program_id(0)
    qi = pl.program_id(1)
    ki = pl.program_id(2)
    nk = pl.num_programs(2)

    H, Hk, D = num_heads, num_kv_heads, head_dim
    g = H // Hk
    ragged_k = (seq_k % block_k) != 0
    ragged_q = (seq_q % block_q) != 0

    # ---- init per (b, q-tile): reset state, cache the scaled q slab ----
    @pl.when(ki == 0)
    def _init():
        m_ref[...] = jnp.full_like(m_ref, -jnp.inf)
        l_ref[...] = jnp.zeros_like(l_ref)
        acc_ref[...] = jnp.zeros_like(acc_ref)
        qs = q_ref[0] * scale                              # (block_q, H*D)
        if ragged_q:
            rowq = (jax.lax.broadcasted_iota(jnp.int32, (block_q, 1), 0)
                    + qi * block_q)
            qs = jnp.where(rowq < seq_q, qs, jnp.zeros_like(qs))
        qs_ref[...] = qs.astype(qs_ref.dtype)

    # ---- combined masks, built ONCE per (q-tile, k-tile), shared by heads ----
    addmask = None                                         # additive, (1, block_k)
    if has_bias:
        addmask = bias_ref[0]                              # (1, block_k) f32
    if ragged_k:
        col1 = (jax.lax.broadcasted_iota(jnp.int32, (1, block_k), 1)
                + ki * block_k)
        kvalid = col1 < seq_k                              # (1, block_k)
        base = addmask if addmask is not None else jnp.zeros((1, block_k),
                                                             jnp.float32)
        addmask = jnp.where(kvalid, base, jnp.float32(_KILL))
        colv = (jax.lax.broadcasted_iota(jnp.int32, (block_k, 1), 0)
                + ki * block_k)
        kv_keep = colv < seq_k                             # (block_k, 1)
    if causal:
        row = (jax.lax.broadcasted_iota(jnp.int32, (block_q, block_k), 0)
               + qi * block_q)
        colf = (jax.lax.broadcasted_iota(jnp.int32, (block_q, block_k), 1)
                + ki * block_k)
        sk_b = sk_ref[b]
        causal_mask = colf > row + sk_b - seq_q
        if ragged_k:
            # never resurrect out-of-range (padding) columns with the -10000 fill
            causal_mask = jnp.logical_and(causal_mask, colf < seq_k)

    exp_dtype = jnp.bfloat16 if use_bf16_exp else jnp.float32

    for hk in range(Hk):
        k_h = kv_ref[0, :, hk * D:(hk + 1) * D]               # (block_k, D)
        v_h = kv_ref[0, :, (Hk + hk) * D:(Hk + hk + 1) * D]   # (block_k, D)
        if ragged_k:
            # zero garbage K/V lanes once per KV head (not once per query head)
            k_h = jnp.where(kv_keep, k_h, jnp.zeros_like(k_h))
            v_h = jnp.where(kv_keep, v_h, jnp.zeros_like(v_h))
        for gi in range(g):
            h = hk * g + gi                                   # einops '(hkv g)'
            q_h = qs_ref[:, h * D:(h + 1) * D]                # pre-scaled
            s = jax.lax.dot_general(                          # MXU: q @ k^T
                q_h, k_h, (((1,), (1,)), ((), ())),
                preferred_element_type=jnp.float32)           # (block_q, block_k)
            if addmask is not None:
                s = s + addmask
            if causal:
                s = jnp.where(causal_mask, jnp.float32(_NEG_BIG), s)

            m_prev = m_ref[:, h:h + 1]                        # (block_q, 1)
            m_new = jnp.maximum(m_prev, jnp.max(s, axis=-1, keepdims=True))
            alpha = jnp.exp(m_prev - m_new)                   # f32, tiny
            p = jnp.exp((s - m_new).astype(exp_dtype))        # EUP (bf16 on v6e/v7x)
            l_ref[:, h:h + 1] = alpha * l_ref[:, h:h + 1] + jnp.sum(
                p, axis=-1, dtype=jnp.float32, keepdims=True)
            pv = jax.lax.dot_general(
                p.astype(v_h.dtype), v_h, (((1,), (0,)), ((), ())),
                preferred_element_type=jnp.float32)           # (block_q, D)
            acc_ref[:, h * D:(h + 1) * D] = (
                alpha * acc_ref[:, h * D:(h + 1) * D] + pv)
            m_ref[:, h:h + 1] = m_new

    # ---- finalize: deferred normalization, single lane-dense store ----
    @pl.when(ki == nk - 1)
    def _finalize():
        for h in range(H):
            l_h = l_ref[:, h:h + 1]
            if exact_recip:
                inv = 1.0 / l_h
            else:
                inv = pl.reciprocal(l_h, approx=True)         # EUP slot
            acc_ref[:, h * D:(h + 1) * D] = acc_ref[:, h * D:(h + 1) * D] * inv
        o_ref[0] = acc_ref[...].astype(o_ref.dtype)
        # TODO(synk): attention dropout (p=0.0 default) is a no-op; a non-zero
        # rate would need pltpu.prng_seed / prng_random_bits applied to p.


def _tpu_vmem_capacity_bytes():
    try:
        return int(pltpu.get_tpu_info().vmem_capacity_bytes)
    except Exception:
        return 64 * 2 ** 20  # conservative (v7x-sized) fallback


def _is_v5e():
    try:
        kind = jax.devices()[0].device_kind.lower()
        return "v5" in kind
    except Exception:
        return False


def cross_attention(q, kv, *, causal=False, softmax_scale=None,
                    key_padding_mask=None, block_q=None, block_k=None):
    B, Sq, H, D = q.shape
    assert kv.ndim == 5 and kv.shape[0] == B and kv.shape[2] == 2 and kv.shape[4] == D
    Sk, Hk = kv.shape[1], kv.shape[3]
    assert H % Hk == 0, "num_heads must be a multiple of num_kv_heads"

    scale = float(softmax_scale) if softmax_scale is not None else 1.0 / math.sqrt(D)

    # -------- per-generation tiling / VMEM budget --------
    vmem_cap = _tpu_vmem_capacity_bytes()
    big_vmem = vmem_cap >= 96 * 2 ** 20            # v5e / v6e (128 MiB)
    if block_q is None:
        block_q = 512 if big_vmem else 256         # v7x keeps 256
    if block_k is None:
        block_k = 512

    def _align(bq, bk):
        bq = Sq if Sq <= bq else max(8, (min(bq, Sq) // 8) * 8)
        bk = Sk if Sk <= bk else max(128, (min(bk, Sk) // 128) * 128)
        return bq, bk

    has_bias = key_padding_mask is not None
    q_isz, kv_isz = q.dtype.itemsize, kv.dtype.itemsize

    def _pad(x, m):
        return -(-x // m) * m

    def _vmem_est(bq, bk):
        bq8, bk8 = _pad(bq, 8), _pad(bk, 8)
        hd = _pad(H * D, 128)
        kvd = _pad(2 * Hk * D, 128)
        bk128 = _pad(bk, 128)
        e = 2 * bq8 * hd * q_isz                   # q blocks (double buffered)
        e += 2 * bk8 * kvd * kv_isz                # kv blocks
        e += 2 * bq8 * hd * q_isz                  # out blocks
        if has_bias:
            e += 2 * 8 * bk128 * 4                 # bias blocks
        e += bq8 * hd * (q_isz + 4)                # qs + acc slabs
        e += 2 * bq8 * _pad(H, 128) * 4            # packed m / l
        e += 6 * bq8 * bk128 * 4                   # addmask/causal + s/p transients
        e += 2 * bk8 * _pad(D, 128) * 4            # per-KV-head k/v temporaries
        return e

    block_q, block_k = _align(block_q, block_k)
    cap = max(32 * 2 ** 20, int(0.75 * vmem_cap))  # headroom below physical VMEM
    while _vmem_est(block_q, block_k) > int(0.85 * cap):
        if block_k >= 256:
            block_k //= 2
        elif block_q >= 256:
            block_q //= 2
        else:
            break
    block_q, block_k = _align(block_q, block_k)
    nq = pl.cdiv(Sq, block_q)
    nk = pl.cdiv(Sk, block_k)
    vmem_limit = int(min(cap, max(32 * 2 ** 20,
                                  int(1.3 * _vmem_est(block_q, block_k)))))

    # -------- masks / scalar prefetch --------
    if has_bias:
        bias = jnp.where(key_padding_mask, 0.0, _NEG_BIG).astype(jnp.float32)
        bias = bias.reshape(B, 1, Sk)
        sk = jnp.sum(key_padding_mask.astype(jnp.int32), axis=-1)
    else:
        bias = None
        sk = jnp.full((B,), Sk, jnp.int32)

    # Free reshapes only (collapse trailing dims) -- no HBM data movement.
    q_flat = q.reshape(B, Sq, H * D)
    kv_flat = kv.reshape(B, Sk, 2 * Hk * D)

    use_bf16_exp = (jnp.dtype(kv.dtype) == jnp.bfloat16) and not _is_v5e()
    exact_recip = jnp.dtype(q.dtype) == jnp.float32

    kernel = functools.partial(
        _flash_cross_attn_kernel,
        scale=scale, causal=bool(causal), has_bias=has_bias,
        use_bf16_exp=use_bf16_exp, exact_recip=exact_recip,
        num_heads=H, num_kv_heads=Hk, head_dim=D,
        seq_q=Sq, seq_k=Sk, block_q=block_q, block_k=block_k)

    in_specs = [
        pl.BlockSpec((1, block_q, H * D), lambda b, qi, ki, sk_p: (b, qi, 0)),
        pl.BlockSpec((1, block_k, 2 * Hk * D), lambda b, qi, ki, sk_p: (b, ki, 0)),
    ]
    inputs = [sk, q_flat, kv_flat]
    if has_bias:
        in_specs.append(pl.BlockSpec((1, 1, block_k),
                                     lambda b, qi, ki, sk_p: (b, 0, ki)))
        inputs.append(bias)

    out_spec = pl.BlockSpec((1, block_q, H * D), lambda b, qi, ki, sk_p: (b, qi, 0))

    scratch = [
        pltpu.VMEM((block_q, H * D), q.dtype),       # softmax-scaled q slab
        pltpu.VMEM((block_q, H), jnp.float32),       # running max  m (packed)
        pltpu.VMEM((block_q, H), jnp.float32),       # running sum  l (packed)
        pltpu.VMEM((block_q, H * D), jnp.float32),   # un-normalized output acc
    ]

    out_flat = pl.pallas_call(
        kernel,
        out_shape=jax.ShapeDtypeStruct((B, Sq, H * D), q.dtype),
        grid_spec=pltpu.PrefetchScalarGridSpec(
            num_scalar_prefetch=1,                   # sk lands in SMEM
            grid=(B, nq, nk),
            in_specs=in_specs,
            out_specs=out_spec,
            scratch_shapes=scratch),
        compiler_params=pltpu.CompilerParams(
            dimension_semantics=("parallel", "parallel", "arbitrary"),
            vmem_limit_bytes=vmem_limit),
    )(*inputs)

    return out_flat.reshape(B, Sq, H, D)


def _reference(q, kv, *, causal, softmax_scale=None, key_padding_mask=None):
    """Pure-JAX transcription of the PyTorch forward for validation."""
    B, Sq, H, D = q.shape
    Sk, Hk = kv.shape[1], kv.shape[3]
    k = kv[:, :, 0]
    v = kv[:, :, 1]
    if Hk != H:
        g = H // Hk
        k = jnp.repeat(k, g, axis=2)
        v = jnp.repeat(v, g, axis=2)
    scale = softmax_scale if softmax_scale is not None else 1.0 / math.sqrt(D)
    scores = jnp.einsum('bthd,bshd->bhts', q, k * scale)
    if key_padding_mask is not None:
        pad = jnp.where(key_padding_mask, 0.0, _NEG_BIG).astype(scores.dtype)
        scores = scores + pad[:, None, None, :]
        sk = key_padding_mask.sum(-1)[:, None, None, None]
    else:
        sk = Sk
    if causal:
        row = jnp.arange(Sq)[:, None]
        col = jnp.arange(Sk)[None, :]
        causal_mask = col[None, None] > row[None, None] + sk - Sq
        scores = jnp.where(causal_mask, _NEG_BIG, scores)
    attn = jax.nn.softmax(scores, axis=-1)
    return jnp.einsum('bhts,bshd->bthd', attn, v)


if __name__ == "__main__":
    key = jax.random.PRNGKey(0)
    kq, kkv, km, kq3, kkv3, km3, kq4, kkv4 = jax.random.split(key, 8)

    # Cases 1 & 2: small single-tile shapes (GQA, causal + padding mask / plain).
    B, Sq, Sk, H, Hk, D = 2, 8, 8, 4, 2, 32
    q = jax.random.normal(kq, (B, Sq, H, D), jnp.float32)
    kv = jax.random.normal(kkv, (B, Sk, 2, Hk, D), jnp.float32)
    key_padding_mask = jax.random.uniform(km, (B, Sk)) > 0.3   # True = keep

    out1 = jax.block_until_ready(
        cross_attention(q, kv, causal=True, key_padding_mask=key_padding_mask))
    ref1 = _reference(q, kv, causal=True, key_padding_mask=key_padding_mask)

    out2 = jax.block_until_ready(cross_attention(q, kv, causal=False))
    ref2 = _reference(q, kv, causal=False)

    # Case 3: multi-tile grid with a ragged last K tile + GQA + causal + mask.
    B3, Sq3, Sk3, H3, Hk3, D3 = 2, 16, 320, 4, 2, 32
    q3 = jax.random.normal(kq3, (B3, Sq3, H3, D3), jnp.float32)
    kv3 = jax.random.normal(kkv3, (B3, Sk3, 2, Hk3, D3), jnp.float32)
    mask3 = jax.random.uniform(km3, (B3, Sk3)) > 0.2
    out3 = jax.block_until_ready(
        cross_attention(q3, kv3, causal=True, key_padding_mask=mask3,
                        block_q=8, block_k=128))
    ref3 = _reference(q3, kv3, causal=True, key_padding_mask=mask3)

    # Case 4: bf16 inputs (production path: bf16 MXU + bf16 exp on v6e/v7x).
    q4 = jax.random.normal(kq4, (B, Sq, H, D), jnp.float32)
    kv4 = jax.random.normal(kkv4, (B, Sk, 2, H, D), jnp.float32)
    out4 = jax.block_until_ready(
        cross_attention(q4.astype(jnp.bfloat16), kv4.astype(jnp.bfloat16),
                        causal=True))
    ref4 = _reference(q4, kv4, causal=True)

    assert out1.shape == (B, Sq, H, D) and out2.shape == (B, Sq, H, D)
    assert out3.shape == (B3, Sq3, H3, D3) and out4.shape == (B, Sq, H, D)
    np.testing.assert_allclose(np.asarray(out1), np.asarray(ref1), rtol=2e-3, atol=2e-3)
    np.testing.assert_allclose(np.asarray(out2), np.asarray(ref2), rtol=2e-3, atol=2e-3)
    np.testing.assert_allclose(np.asarray(out3), np.asarray(ref3), rtol=2e-3, atol=2e-3)
    np.testing.assert_allclose(np.asarray(out4, dtype=np.float32), np.asarray(ref4),
                               rtol=5e-2, atol=6e-2)
    print("KERNEL_OK")
</pallas_src>

<mosaic_0001>
module attributes {stable_mosaic.version = 11 : i64} {
  func.func @_flash_cross_attn_kernel(%arg0: i32, %arg1: i32, %arg2: i32, %arg3: memref<2xi32, #tpu.memory_space<smem>>, %arg4: memref<1x8x128xf32, #tpu.memory_space<vmem>>, %arg5: memref<1x8x128xf32, #tpu.memory_space<vmem>>, %arg6: memref<1x1x8xf32, #tpu.memory_space<vmem>>, %arg7: memref<1x8x128xf32, #tpu.memory_space<vmem>>, %arg8: memref<8x128xf32, #tpu.memory_space<vmem>>, %arg9: memref<8x4xf32, #tpu.memory_space<vmem>>, %arg10: memref<8x4xf32, #tpu.memory_space<vmem>>, %arg11: memref<8x128xf32, #tpu.memory_space<vmem>>) attributes {dimension_semantics = [#tpu.dimension_semantics<parallel>, #tpu.dimension_semantics<parallel>, #tpu.dimension_semantics<arbitrary>], iteration_bounds = array<i64: 2, 1, 1>, scalar_prefetch = 1 : i64, scratch_operands = 4 : i64, tpu.core_type = #tpu.core_type<tc>, window_params = [{transform_indices = @transform_0, window_bounds = array<i64: 1, 8, 128>}, {transform_indices = @transform_1, window_bounds = array<i64: 1, 8, 128>}, {transform_indices = @transform_2, window_bounds = array<i64: 1, 1, 8>}, {transform_indices = @transform_3, window_bounds = array<i64: 1, 8, 128>}]} {
    %c0_i32 = arith.constant 0 : i32
    %0 = arith.cmpi eq, %arg2, %c0_i32 : i32
    %1 = arith.extui %0 : i1 to i32
    %c0_i32_0 = arith.constant 0 : i32
    %2 = arith.cmpi ne, %1, %c0_i32_0 : i32
    scf.if %2 {
      %cst_88 = arith.constant 0xFF800000 : f32
      %143 = vector.broadcast %cst_88 : f32 to vector<8x4xf32>
      %c0_89 = arith.constant 0 : index
      %c0_90 = arith.constant 0 : index
      %144 = vector.load %arg9[%c0_89, %c0_90] : memref<8x4xf32, #tpu.memory_space<vmem>>, vector<8x4xf32>
      tpu.vector_store %arg9[%c0_89, %c0_90], %143 {strides = array<i32>} : memref<8x4xf32, #tpu.memory_space<vmem>>, vector<8x4xf32>,
      %cst_91 = arith.constant 0.000000e+00 : f32
      %145 = vector.broadcast %cst_91 : f32 to vector<8x4xf32>
      %c0_92 = arith.constant 0 : index
      %c0_93 = arith.constant 0 : index
      %146 = vector.load %arg10[%c0_92, %c0_93] : memref<8x4xf32, #tpu.memory_space<vmem>>, vector<8x4xf32>
      tpu.vector_store %arg10[%c0_92, %c0_93], %145 {strides = array<i32>} : memref<8x4xf32, #tpu.memory_space<vmem>>, vector<8x4xf32>,
      %cst_94 = arith.constant 0.000000e+00 : f32
      %147 = vector.broadcast %cst_94 : f32 to vector<8x128xf32>
      %c0_95 = arith.constant 0 : index
      %c0_96 = arith.constant 0 : index
      %148 = vector.load %arg11[%c0_95, %c0_96] : memref<8x128xf32, #tpu.memory_space<vmem>>, vector<8x128xf32>
      tpu.vector_store %arg11[%c0_95, %c0_96], %147 {strides = array<i32>} : memref<8x128xf32, #tpu.memory_space<vmem>>, vector<8x128xf32>,
      %c0_97 = arith.constant 0 : index
      %c0_98 = arith.constant 0 : index
      %c0_99 = arith.constant 0 : index
      %149 = vector.load %arg4[%c0_97, %c0_98, %c0_99] : memref<1x8x128xf32, #tpu.memory_space<vmem>>, vector<1x8x128xf32>
      %150 = vector.shape_cast %149 : vector<1x8x128xf32> to vector<8x128xf32>
      %cst_100 = arith.constant 0.176776692 : f32
      %151 = vector.broadcast %cst_100 : f32 to vector<8x128xf32>
      %152 = arith.mulf %150, %151 : vector<8x128xf32>
      %c0_101 = arith.constant 0 : index
      %c0_102 = arith.constant 0 : index
      %153 = vector.load %arg8[%c0_101, %c0_102] : memref<8x128xf32, #tpu.memory_space<vmem>>, vector<8x128xf32>
      tpu.vector_store %arg8[%c0_101, %c0_102], %152 {strides = array<i32>} : memref<8x128xf32, #tpu.memory_space<vmem>>, vector<8x128xf32>,
    } else {
    }
    %c0 = arith.constant 0 : index
    %c0_1 = arith.constant 0 : index
    %c0_2 = arith.constant 0 : index
    %3 = vector.load %arg6[%c0, %c0_1, %c0_2] : memref<1x1x8xf32, #tpu.memory_space<vmem>>, vector<1x1x8xf32>
    %4 = vector.shape_cast %3 : vector<1x1x8xf32> to vector<1x8xf32>
    %5 = tpu.iota {dimensions = array<i32: 0>} : vector<8x8xi32>
    %c8_i32 = arith.constant 8 : i32
    %6 = arith.muli %arg1, %c8_i32 : i32
    %7 = vector.broadcast %6 : i32 to vector<8x8xi32>
    %8 = arith.addi %5, %7 : vector<8x8xi32>
    %9 = tpu.iota {dimensions = array<i32: 1>} : vector<8x8xi32>
    %c8_i32_3 = arith.constant 8 : i32
    %10 = arith.muli %arg2, %c8_i32_3 : i32
    %11 = vector.broadcast %10 : i32 to vector<8x8xi32>
    %12 = arith.addi %9, %11 : vector<8x8xi32>
    %13 = arith.index_cast %arg0 : i32 to index
    %14 = memref.load %arg3[%13] : memref<2xi32, #tpu.memory_space<smem>>
    %15 = vector.broadcast %14 : i32 to vector<8x8xi32>
    %16 = arith.addi %8, %15 : vector<8x8xi32>
    %c8_i32_4 = arith.constant 8 : i32
    %17 = vector.broadcast %c8_i32_4 : i32 to vector<8x8xi32>
    %18 = arith.subi %16, %17 : vector<8x8xi32>
    %19 = arith.cmpi sgt, %12, %18 : vector<8x8xi32>
    %c0_5 = arith.constant 0 : index
    %c0_6 = arith.constant 0 : index
    %c0_7 = arith.constant 0 : index
    %20 = vector.load %arg5[%c0_5, %c0_6, %c0_7] : memref<1x8x128xf32, #tpu.memory_space<vmem>>, vector<1x8x32xf32>
    %21 = vector.shape_cast %20 : vector<1x8x32xf32> to vector<8x32xf32>
    %c0_8 = arith.constant 0 : index
    %c0_9 = arith.constant 0 : index
    %c64 = arith.constant 64 : index
    %22 = vector.load %arg5[%c0_8, %c0_9, %c64] : memref<1x8x128xf32, #tpu.memory_space<vmem>>, vector<1x8x32xf32>
    %23 = vector.shape_cast %22 : vector<1x8x32xf32> to vector<8x32xf32>
    %c0_10 = arith.constant 0 : index
    %c0_11 = arith.constant 0 : index
    %24 = vector.load %arg8[%c0_10, %c0_11] : memref<8x128xf32, #tpu.memory_space<vmem>>, vector<8x32xf32>
    %cst = arith.constant dense<0.000000e+00> : vector<8x8xf32>
    %25 = tpu.matmul %24, %21, %cst {dimension_numbers = #tpu.dot_dimension_numbers<[1], [1], [0], [0], [0, 0, 1, 0], [], []>} : vector<8x32xf32>, vector<8x32xf32>, vector<8x8xf32> -> vector<8x8xf32>
    %26 = vector.broadcast %4 : vector<1x8xf32> to vector<8x8xf32>
    %27 = arith.addf %25, %26 : vector<8x8xf32>
    %cst_12 = arith.constant -1.000000e+04 : f32
    %28 = vector.broadcast %cst_12 : f32 to vector<8x8xf32>
    %29 = arith.select %19, %28, %27 : vector<8x8xi1>, vector<8x8xf32>
    %c0_13 = arith.constant 0 : index
    %c0_14 = arith.constant 0 : index
    %30 = vector.load %arg9[%c0_13, %c0_14] : memref<8x4xf32, #tpu.memory_space<vmem>>, vector<8x1xf32>
    %cst_15 = arith.constant dense<0xFF800000> : vector<8xf32>
    %31 = vector.multi_reduction <maximumf>, %29, %cst_15 [1] : vector<8x8xf32> to vector<8xf32>
    %32 = vector.shape_cast %31 : vector<8xf32> to vector<8x1xf32>
    %33 = arith.maximumf %30, %32 : vector<8x1xf32>
    %34 = arith.subf %30, %33 : vector<8x1xf32>
    %35 = math.exp %34 : vector<8x1xf32>
    %36 = vector.broadcast %33 : vector<8x1xf32> to vector<8x8xf32>
    %37 = arith.subf %29, %36 : vector<8x8xf32>
    %38 = math.exp %37 : vector<8x8xf32>
    %c0_16 = arith.constant 0 : index
    %c0_17 = arith.constant 0 : index
    %39 = vector.load %arg10[%c0_16, %c0_17] : memref<8x4xf32, #tpu.memory_space<vmem>>, vector<8x1xf32>
    %40 = arith.mulf %35, %39 : vector<8x1xf32>
    %cst_18 = arith.constant dense<0.000000e+00> : vector<8xf32>
    %41 = vector.multi_reduction <add>, %38, %cst_18 [1] : vector<8x8xf32> to vector<8xf32>
    %42 = vector.shape_cast %41 : vector<8xf32> to vector<8x1xf32>
    %43 = arith.addf %40, %42 : vector<8x1xf32>
    %c0_19 = arith.constant 0 : index
    %c0_20 = arith.constant 0 : index
    %44 = vector.load %arg10[%c0_19, %c0_20] : memref<8x4xf32, #tpu.memory_space<vmem>>, vector<8x1xf32>
    tpu.vector_store %arg10[%c0_19, %c0_20], %43 {strides = array<i32>} : memref<8x4xf32, #tpu.memory_space<vmem>>, vector<8x1xf32>,
    %cst_21 = arith.constant dense<0.000000e+00> : vector<8x32xf32>
    %45 = tpu.matmul %38, %23, %cst_21 {dimension_numbers = #tpu.dot_dimension_numbers<[1], [0], [0], [1], [0, 0, 1, 1], [], []>} : vector<8x8xf32>, vector<8x32xf32>, vector<8x32xf32> -> vector<8x32xf32>
    %c0_22 = arith.constant 0 : index
    %c0_23 = arith.constant 0 : index
    %46 = vector.load %arg11[%c0_22, %c0_23] : memref<8x128xf32, #tpu.memory_space<vmem>>, vector<8x32xf32>
    %47 = vector.broadcast %35 : vector<8x1xf32> to vector<8x32xf32>
    %48 = arith.mulf %47, %46 : vector<8x32xf32>
    %49 = arith.addf %48, %45 : vector<8x32xf32>
    %c0_24 = arith.constant 0 : index
    %c0_25 = arith.constant 0 : index
    %50 = vector.load %arg11[%c0_24, %c0_25] : memref<8x128xf32, #tpu.memory_space<vmem>>, vector<8x32xf32>
    tpu.vector_store %arg11[%c0_24, %c0_25], %49 {strides = array<i32>} : memref<8x128xf32, #tpu.memory_space<vmem>>, vector<8x32xf32>,
    %c0_26 = arith.constant 0 : index
    %c0_27 = arith.constant 0 : index
    %51 = vector.load %arg9[%c0_26, %c0_27] : memref<8x4xf32, #tpu.memory_space<vmem>>, vector<8x1xf32>
    tpu.vector_store %arg9[%c0_26, %c0_27], %33 {strides = array<i32>} : memref<8x4xf32, #tpu.memory_space<vmem>>, vector<8x1xf32>,
    %c0_28 = arith.constant 0 : index
    %c32 = arith.constant 32 : index
    %52 = vector.load %arg8[%c0_28, %c32] : memref<8x128xf32, #tpu.memory_space<vmem>>, vector<8x32xf32>
    %cst_29 = arith.constant dense<0.000000e+00> : vector<8x8xf32>
    %53 = tpu.matmul %52, %21, %cst_29 {dimension_numbers = #tpu.dot_dimension_numbers<[1], [1], [0], [0], [0, 0, 1, 0], [], []>} : vector<8x32xf32>, vector<8x32xf32>, vector<8x8xf32> -> vector<8x8xf32>
    %54 = vector.broadcast %4 : vector<1x8xf32> to vector<8x8xf32>
    %55 = arith.addf %53, %54 : vector<8x8xf32>
    %cst_30 = arith.constant -1.000000e+04 : f32
    %56 = vector.broadcast %cst_30 : f32 to vector<8x8xf32>
    %57 = arith.select %19, %56, %55 : vector<8x8xi1>, vector<8x8xf32>
    %c0_31 = arith.constant 0 : index
    %c1 = arith.constant 1 : index
    %58 = vector.load %arg9[%c0_31, %c1] : memref<8x4xf32, #tpu.memory_space<vmem>>, vector<8x1xf32>
    %cst_32 = arith.constant dense<0xFF800000> : vector<8xf32>
    %59 = vector.multi_reduction <maximumf>, %57, %cst_32 [1] : vector<8x8xf32> to vector<8xf32>
    %60 = vector.shape_cast %59 : vector<8xf32> to vector<8x1xf32>
    %61 = arith.maximumf %58, %60 : vector<8x1xf32>
    %62 = arith.subf %58, %61 : vector<8x1xf32>
    %63 = math.exp %62 : vector<8x1xf32>
    %64 = vector.broadcast %61 : vector<8x1xf32> to vector<8x8xf32>
    %65 = arith.subf %57, %64 : vector<8x8xf32>
    %66 = math.exp %65 : vector<8x8xf32>
    %c0_33 = arith.constant 0 : index
    %c1_34 = arith.constant 1 : index
    %67 = vector.load %arg10[%c0_33, %c1_34] : memref<8x4xf32, #tpu.memory_space<vmem>>, vector<8x1xf32>
    %68 = arith.mulf %63, %67 : vector<8x1xf32>
    %cst_35 = arith.constant dense<0.000000e+00> : vector<8xf32>
    %69 = vector.multi_reduction <add>, %66, %cst_35 [1] : vector<8x8xf32> to vector<8xf32>
    %70 = vector.shape_cast %69 : vector<8xf32> to vector<8x1xf32>
    %71 = arith.addf %68, %70 : vector<8x1xf32>
    %c0_36 = arith.constant 0 : index
    %c1_37 = arith.constant 1 : index
    %72 = vector.load %arg10[%c0_36, %c1_37] : memref<8x4xf32, #tpu.memory_space<vmem>>, vector<8x1xf32>
    tpu.vector_store %arg10[%c0_36, %c1_37], %71 {strides = array<i32>} : memref<8x4xf32, #tpu.memory_space<vmem>>, vector<8x1xf32>,
    %cst_38 = arith.constant dense<0.000000e+00> : vector<8x32xf32>
    %73 = tpu.matmul %66, %23, %cst_38 {dimension_numbers = #tpu.dot_dimension_numbers<[1], [0], [0], [1], [0, 0, 1, 1], [], []>} : vector<8x8xf32>, vector<8x32xf32>, vector<8x32xf32> -> vector<8x32xf32>
    %c0_39 = arith.constant 0 : index
    %c32_40 = arith.constant 32 : index
    %74 = vector.load %arg11[%c0_39, %c32_40] : memref<8x128xf32, #tpu.memory_space<vmem>>, vector<8x32xf32>
    %75 = vector.broadcast %63 : vector<8x1xf32> to vector<8x32xf32>
    %76 = arith.mulf %75, %74 : vector<8x32xf32>
    %77 = arith.addf %76, %73 : vector<8x32xf32>
    %c0_41 = arith.constant 0 : index
    %c32_42 = arith.constant 32 : index
    %78 = vector.load %arg11[%c0_41, %c32_42] : memref<8x128xf32, #tpu.memory_space<vmem>>, vector<8x32xf32>
    tpu.vector_store %arg11[%c0_41, %c32_42], %77 {strides = array<i32>} : memref<8x128xf32, #tpu.memory_space<vmem>>, vector<8x32xf32>,
    %c0_43 = arith.constant 0 : index
    %c1_44 = arith.constant 1 : index
    %79 = vector.load %arg9[%c0_43, %c1_44] : memref<8x4xf32, #tpu.memory_space<vmem>>, vector<8x1xf32>
    tpu.vector_store %arg9[%c0_43, %c1_44], %61 {strides = array<i32>} : memref<8x4xf32, #tpu.memory_space<vmem>>, vector<8x1xf32>,
    %c0_45 = arith.constant 0 : index
    %c0_46 = arith.constant 0 : index
    %c32_47 = arith.constant 32 : index
    %80 = vector.load %arg5[%c0_45, %c0_46, %c32_47] : memref<1x8x128xf32, #tpu.memory_space<vmem>>, vector<1x8x32xf32>
    %81 = vector.shape_cast %80 : vector<1x8x32xf32> to vector<8x32xf32>
    %c0_48 = arith.constant 0 : index
    %c0_49 = arith.constant 0 : index
    %c96 = arith.constant 96 : index
    %82 = vector.load %arg5[%c0_48, %c0_49, %c96] : memref<1x8x128xf32, #tpu.memory_space<vmem>>, vector<1x8x32xf32>
    %83 = vector.shape_cast %82 : vector<1x8x32xf32> to vector<8x32xf32>
    %c0_50 = arith.constant 0 : index
    %c64_51 = arith.constant 64 : index
    %84 = vector.load %arg8[%c0_50, %c64_51] : memref<8x128xf32, #tpu.memory_space<vmem>>, vector<8x32xf32>
    %cst_52 = arith.constant dense<0.000000e+00> : vector<8x8xf32>
    %85 = tpu.matmul %84, %81, %cst_52 {dimension_numbers = #tpu.dot_dimension_numbers<[1], [1], [0], [0], [0, 0, 1, 0], [], []>} : vector<8x32xf32>, vector<8x32xf32>, vector<8x8xf32> -> vector<8x8xf32>
    %86 = vector.broadcast %4 : vector<1x8xf32> to vector<8x8xf32>
    %87 = arith.addf %85, %86 : vector<8x8xf32>
    %cst_53 = arith.constant -1.000000e+04 : f32
    %88 = vector.broadcast %cst_53 : f32 to vector<8x8xf32>
    %89 = arith.select %19, %88, %87 : vector<8x8xi1>, vector<8x8xf32>
    %c0_54 = arith.constant 0 : index
    %c2 = arith.constant 2 : index
    %90 = vector.load %arg9[%c0_54, %c2] : memref<8x4xf32, #tpu.memory_space<vmem>>, vector<8x1xf32>
    %cst_55 = arith.constant dense<0xFF800000> : vector<8xf32>
    %91 = vector.multi_reduction <maximumf>, %89, %cst_55 [1] : vector<8x8xf32> to vector<8xf32>
    %92 = vector.shape_cast %91 : vector<8xf32> to vector<8x1xf32>
    %93 = arith.maximumf %90, %92 : vector<8x1xf32>
    %94 = arith.subf %90, %93 : vector<8x1xf32>
    %95 = math.exp %94 : vector<8x1xf32>
    %96 = vector.broadcast %93 : vector<8x1xf32> to vector<8x8xf32>
    %97 = arith.subf %89, %96 : vector<8x8xf32>
    %98 = math.exp %97 : vector<8x8xf32>
    %c0_56 = arith.constant 0 : index
    %c2_57 = arith.constant 2 : index
    %99 = vector.load %arg10[%c0_56, %c2_57] : memref<8x4xf32, #tpu.memory_space<vmem>>, vector<8x1xf32>
    %100 = arith.mulf %95, %99 : vector<8x1xf32>
    %cst_58 = arith.constant dense<0.000000e+00> : vector<8xf32>
    %101 = vector.multi_reduction <add>, %98, %cst_58 [1] : vector<8x8xf32> to vector<8xf32>
    %102 = vector.shape_cast %101 : vector<8xf32> to vector<8x1xf32>
    %103 = arith.addf %100, %102 : vector<8x1xf32>
    %c0_59 = arith.constant 0 : index
    %c2_60 = arith.constant 2 : index
    %104 = vector.load %arg10[%c0_59, %c2_60] : memref<8x4xf32, #tpu.memory_space<vmem>>, vector<8x1xf32>
    tpu.vector_store %arg10[%c0_59, %c2_60], %103 {strides = array<i32>} : memref<8x4xf32, #tpu.memory_space<vmem>>, vector<8x1xf32>,
    %cst_61 = arith.constant dense<0.000000e+00> : vector<8x32xf32>
    %105 = tpu.matmul %98, %83, %cst_61 {dimension_numbers = #tpu.dot_dimension_numbers<[1], [0], [0], [1], [0, 0, 1, 1], [], []>} : vector<8x8xf32>, vector<8x32xf32>, vector<8x32xf32> -> vector<8x32xf32>
    %c0_62 = arith.constant 0 : index
    %c64_63 = arith.constant 64 : index
    %106 = vector.load %arg11[%c0_62, %c64_63] : memref<8x128xf32, #tpu.memory_space<vmem>>, vector<8x32xf32>
    %107 = vector.broadcast %95 : vector<8x1xf32> to vector<8x32xf32>
    %108 = arith.mulf %107, %106 : vector<8x32xf32>
    %109 = arith.addf %108, %105 : vector<8x32xf32>
    %c0_64 = arith.constant 0 : index
    %c64_65 = arith.constant 64 : index
    %110 = vector.load %arg11[%c0_64, %c64_65] : memref<8x128xf32, #tpu.memory_space<vmem>>, vector<8x32xf32>
    tpu.vector_store %arg11[%c0_64, %c64_65], %109 {strides = array<i32>} : memref<8x128xf32, #tpu.memory_space<vmem>>, vector<8x32xf32>,
    %c0_66 = arith.constant 0 : index
    %c2_67 = arith.constant 2 : index
    %111 = vector.load %arg9[%c0_66, %c2_67] : memref<8x4xf32, #tpu.memory_space<vmem>>, vector<8x1xf32>
    tpu.vector_store %arg9[%c0_66, %c2_67], %93 {strides = array<i32>} : memref<8x4xf32, #tpu.memory_space<vmem>>, vector<8x1xf32>,
    %c0_68 = arith.constant 0 : index
    %c96_69 = arith.constant 96 : index
    %112 = vector.load %arg8[%c0_68, %c96_69] : memref<8x128xf32, #tpu.memory_space<vmem>>, vector<8x32xf32>
    %cst_70 = arith.constant dense<0.000000e+00> : vector<8x8xf32>
    %113 = tpu.matmul %112, %81, %cst_70 {dimension_numbers = #tpu.dot_dimension_numbers<[1], [1], [0], [0], [0, 0, 1, 0], [], []>} : vector<8x32xf32>, vector<8x32xf32>, vector<8x8xf32> -> vector<8x8xf32>
    %114 = vector.broadcast %4 : vector<1x8xf32> to vector<8x8xf32>
    %115 = arith.addf %113, %114 : vector<8x8xf32>
    %cst_71 = arith.constant -1.000000e+04 : f32
    %116 = vector.broadcast %cst_71 : f32 to vector<8x8xf32>
    %117 = arith.select %19, %116, %115 : vector<8x8xi1>, vector<8x8xf32>
    %c0_72 = arith.constant 0 : index
    %c3 = arith.constant 3 : index
    %118 = vector.load %arg9[%c0_72, %c3] : memref<8x4xf32, #tpu.memory_space<vmem>>, vector<8x1xf32>
    %cst_73 = arith.constant dense<0xFF800000> : vector<8xf32>
    %119 = vector.multi_reduction <maximumf>, %117, %cst_73 [1] : vector<8x8xf32> to vector<8xf32>
    %120 = vector.shape_cast %119 : vector<8xf32> to vector<8x1xf32>
    %121 = arith.maximumf %118, %120 : vector<8x1xf32>
    %122 = arith.subf %118, %121 : vector<8x1xf32>
    %123 = math.exp %122 : vector<8x1xf32>
    %124 = vector.broadcast %121 : vector<8x1xf32> to vector<8x8xf32>
    %125 = arith.subf %117, %124 : vector<8x8xf32>
    %126 = math.exp %125 : vector<8x8xf32>
    %c0_74 = arith.constant 0 : index
    %c3_75 = arith.constant 3 : index
    %127 = vector.load %arg10[%c0_74, %c3_75] : memref<8x4xf32, #tpu.memory_space<vmem>>, vector<8x1xf32>
    %128 = arith.mulf %123, %127 : vector<8x1xf32>
    %cst_76 = arith.constant dense<0.000000e+00> : vector<8xf32>
    %129 = vector.multi_reduction <add>, %126, %cst_76 [1] : vector<8x8xf32> to vector<8xf32>
    %130 = vector.shape_cast %129 : vector<8xf32> to vector<8x1xf32>
    %131 = arith.addf %128, %130 : vector<8x1xf32>
    %c0_77 = arith.constant 0 : index
    %c3_78 = arith.constant 3 : index
    %132 = vector.load %arg10[%c0_77, %c3_78] : memref<8x4xf32, #tpu.memory_space<vmem>>, vector<8x1xf32>
    tpu.vector_store %arg10[%c0_77, %c3_78], %131 {strides = array<i32>} : memref<8x4xf32, #tpu.memory_space<vmem>>, vector<8x1xf32>,
    %cst_79 = arith.constant dense<0.000000e+00> : vector<8x32xf32>
    %133 = tpu.matmul %126, %83, %cst_79 {dimension_numbers = #tpu.dot_dimension_numbers<[1], [0], [0], [1], [0, 0, 1, 1], [], []>} : vector<8x8xf32>, vector<8x32xf32>, vector<8x32xf32> -> vector<8x32xf32>
    %c0_80 = arith.constant 0 : index
    %c96_81 = arith.constant 96 : index
    %134 = vector.load %arg11[%c0_80, %c96_81] : memref<8x128xf32, #tpu.memory_space<vmem>>, vector<8x32xf32>
    %135 = vector.broadcast %123 : vector<8x1xf32> to vector<8x32xf32>
    %136 = arith.mulf %135, %134 : vector<8x32xf32>
    %137 = arith.addf %136, %133 : vector<8x32xf32>
    %c0_82 = arith.constant 0 : index
    %c96_83 = arith.constant 96 : index
    %138 = vector.load %arg11[%c0_82, %c96_83] : memref<8x128xf32, #tpu.memory_space<vmem>>, vector<8x32xf32>
    tpu.vector_store %arg11[%c0_82, %c96_83], %137 {strides = array<i32>} : memref<8x128xf32, #tpu.memory_space<vmem>>, vector<8x32xf32>,
    %c0_84 = arith.constant 0 : index
    %c3_85 = arith.constant 3 : index
    %139 = vector.load %arg9[%c0_84, %c3_85] : memref<8x4xf32, #tpu.memory_space<vmem>>, vector<8x1xf32>
    tpu.vector_store %arg9[%c0_84, %c3_85], %121 {strides = array<i32>} : memref<8x4xf32, #tpu.memory_space<vmem>>, vector<8x1xf32>,
    %c0_i32_86 = arith.constant 0 : i32
    %140 = arith.cmpi eq, %arg2, %c0_i32_86 : i32
    %141 = arith.extui %140 : i1 to i32
    %c0_i32_87 = arith.constant 0 : i32
    %142 = arith.cmpi ne, %141, %c0_i32_87 : i32
    scf.if %142 {
      %c0_88 = arith.constant 0 : index
      %c0_89 = arith.constant 0 : index
      %143 = vector.load %arg10[%c0_88, %c0_89] : memref<8x4xf32, #tpu.memory_space<vmem>>, vector<8x1xf32>
      %cst_90 = arith.constant 1.000000e+00 : f32
      %144 = vector.broadcast %cst_90 : f32 to vector<8x1xf32>
      %145 = arith.divf %144, %143 : vector<8x1xf32>
      %c0_91 = arith.constant 0 : index
      %c0_92 = arith.constant 0 : index
      %146 = vector.load %arg11[%c0_91, %c0_92] : memref<8x128xf32, #tpu.memory_space<vmem>>, vector<8x32xf32>
      %147 = vector.broadcast %145 : vector<8x1xf32> to vector<8x32xf32>
      %148 = arith.mulf %146, %147 : vector<8x32xf32>
      %c0_93 = arith.constant 0 : index
      %c0_94 = arith.constant 0 : index
      %149 = vector.load %arg11[%c0_93, %c0_94] : memref<8x128xf32, #tpu.memory_space<vmem>>, vector<8x32xf32>
      tpu.vector_store %arg11[%c0_93, %c0_94], %148 {strides = array<i32>} : memref<8x128xf32, #tpu.memory_space<vmem>>, vector<8x32xf32>,
      %c0_95 = arith.constant 0 : index
      %c1_96 = arith.constant 1 : index
      %150 = vector.load %arg10[%c0_95, %c1_96] : memref<8x4xf32, #tpu.memory_space<vmem>>, vector<8x1xf32>
      %cst_97 = arith.constant 1.000000e+00 : f32
      %151 = vector.broadcast %cst_97 : f32 to vector<8x1xf32>
      %152 = arith.divf %151, %150 : vector<8x1xf32>
      %c0_98 = arith.constant 0 : index
      %c32_99 = arith.constant 32 : index
      %153 = vector.load %arg11[%c0_98, %c32_99] : memref<8x128xf32, #tpu.memory_space<vmem>>, vector<8x32xf32>
      %154 = vector.broadcast %152 : vector<8x1xf32> to vector<8x32xf32>
      %155 = arith.mulf %153, %154 : vector<8x32xf32>
      %c0_100 = arith.constant 0 : index
      %c32_101 = arith.constant 32 : index
      %156 = vector.load %arg11[%c0_100, %c32_101] : memref<8x128xf32, #tpu.memory_space<vmem>>, vector<8x32xf32>
      tpu.vector_store %arg11[%c0_100, %c32_101], %155 {strides = array<i32>} : memref<8x128xf32, #tpu.memory_space<vmem>>, vector<8x32xf32>,
      %c0_102 = arith.constant 0 : index
      %c2_103 = arith.constant 2 : index
      %157 = vector.load %arg10[%c0_102, %c2_103] : memref<8x4xf32, #tpu.memory_space<vmem>>, vector<8x1xf32>
      %cst_104 = arith.constant 1.000000e+00 : f32
      %158 = vector.broadcast %cst_104 : f32 to vector<8x1xf32>
      %159 = arith.divf %158, %157 : vector<8x1xf32>
      %c0_105 = arith.constant 0 : index
      %c64_106 = arith.constant 64 : index
      %160 = vector.load %arg11[%c0_105, %c64_106] : memref<8x128xf32, #tpu.memory_space<vmem>>, vector<8x32xf32>
      %161 = vector.broadcast %159 : vector<8x1xf32> to vector<8x32xf32>
      %162 = arith.mulf %160, %161 : vector<8x32xf32>
      %c0_107 = arith.constant 0 : index
      %c64_108 = arith.constant 64 : index
      %163 = vector.load %arg11[%c0_107, %c64_108] : memref<8x128xf32, #tpu.memory_space<vmem>>, vector<8x32xf32>
      tpu.vector_store %arg11[%c0_107, %c64_108], %162 {strides = array<i32>} : memref<8x128xf32, #tpu.memory_space<vmem>>, vector<8x32xf32>,
      %c0_109 = arith.constant 0 : index
      %c3_110 = arith.constant 3 : index
      %164 = vector.load %arg10[%c0_109, %c3_110] : memref<8x4xf32, #tpu.memory_space<vmem>>, vector<8x1xf32>
      %cst_111 = arith.constant 1.000000e+00 : f32
      %165 = vector.broadcast %cst_111 : f32 to vector<8x1xf32>
      %166 = arith.divf %165, %164 : vector<8x1xf32>
      %c0_112 = arith.constant 0 : index
      %c96_113 = arith.constant 96 : index
      %167 = vector.load %arg11[%c0_112, %c96_113] : memref<8x128xf32, #tpu.memory_space<vmem>>, vector<8x32xf32>
      %168 = vector.broadcast %166 : vector<8x1xf32> to vector<8x32xf32>
      %169 = arith.mulf %167, %168 : vector<8x32xf32>
      %c0_114 = arith.constant 0 : index
      %c96_115 = arith.constant 96 : index
      %170 = vector.load %arg11[%c0_114, %c96_115] : memref<8x128xf32, #tpu.memory_space<vmem>>, vector<8x32xf32>
      tpu.vector_store %arg11[%c0_114, %c96_115], %169 {strides = array<i32>} : memref<8x128xf32, #tpu.memory_space<vmem>>, vector<8x32xf32>,
      %c0_116 = arith.constant 0 : index
      %c0_117 = arith.constant 0 : index
      %171 = vector.load %arg11[%c0_116, %c0_117] : memref<8x128xf32, #tpu.memory_space<vmem>>, vector<8x128xf32>
      %c0_118 = arith.constant 0 : index
      %c0_119 = arith.constant 0 : index
      %c0_120 = arith.constant 0 : index
      %172 = vector.load %arg7[%c0_118, %c0_119, %c0_120] : memref<1x8x128xf32, #tpu.memory_space<vmem>>, vector<1x8x128xf32>
      %173 = vector.shape_cast %172 : vector<1x8x128xf32> to vector<8x128xf32>
      %174 = vector.shape_cast %171 : vector<8x128xf32> to vector<1x8x128xf32>
      tpu.vector_store %arg7[%c0_118, %c0_119, %c0_120], %174 {strides = array<i32>} : memref<1x8x128xf32, #tpu.memory_space<vmem>>, vector<1x8x128xf32>,
    } else {
    }
    return
  }
  func.func @transform_0(%arg0: i32, %arg1: i32, %arg2: i32, %arg3: memref<2xi32, #tpu.memory_space<smem>>) -> (i32, i32, i32) {
    %c0_i32 = arith.constant 0 : i32
    %c0_i32_0 = arith.constant 0 : i32
    return %arg0, %arg1, %c0_i32 : i32, i32, i32
  }
  func.func @transform_1(%arg0: i32, %arg1: i32, %arg2: i32, %arg3: memref<2xi32, #tpu.memory_space<smem>>) -> (i32, i32, i32) {
    %c0_i32 = arith.constant 0 : i32
    %c0_i32_0 = arith.constant 0 : i32
    return %arg0, %arg2, %c0_i32 : i32, i32, i32
  }
  func.func @transform_2(%arg0: i32, %arg1: i32, %arg2: i32, %arg3: memref<2xi32, #tpu.memory_space<smem>>) -> (i32, i32, i32) {
    %c0_i32 = arith.constant 0 : i32
    %c0_i32_0 = arith.constant 0 : i32
    return %arg0, %c0_i32, %arg2 : i32, i32, i32
  }
  func.func @transform_3(%arg0: i32, %arg1: i32, %arg2: i32, %arg3: memref<2xi32, #tpu.memory_space<smem>>) -> (i32, i32, i32) {
    %c0_i32 = arith.constant 0 : i32
    %c0_i32_0 = arith.constant 0 : i32
    return %arg0, %arg1, %c0_i32 : i32, i32, i32
  }
}

</mosaic_0001>

<bundles_post_ra>
// kernel: tpu_custom_call.1
= control target key start
LH: loop header
LB: loop body
LE: loop exit
PB: predicated region body
PF: predicated region fallthrough
CT: control target
= control target key end

     0   :  { %s1219_s18 = smov [#allocation7]   ;;  %s1487_s0 = inlined_call_operand.hbm [shape: s32[2], index: 0, kind: input, shape index: {}]   ;;  %s1488_s1 = inlined_call_operand.hbm [shape: f32[2,8,128], index: 1, kind: input, shape index: {}]   ;;  %s1489_s2 = inlined_call_operand.hbm [shape: f32[2,8,128], index: 2, kind: input, shape index: {}]   ;;  %s1490_s3 = inlined_call_operand.vmem [shape: f32[2,1,8], index: 3, kind: input, shape index: {}]   ;;  %s1491_s4 = inlined_call_operand.hbm [shape: f32[2,8,128], index: 4, kind: output, shape index: {}]  }
   0x1   :  { %s10_s17 = sshll.u32 %s1487_s0, 4  ;;  %s11_s17 = int_to_ptr.hbm [resolvable:$true] %s10_s17 }
   0x2   :  { %13 = dma.hbm_to_smem %s11_s17, 16, %s1219_s18, [#allocation6] }
   0x3   :  { %1181 = dma.done.wait [#allocation6], 16 }
   0x4   :  { %1182 = vsyncadd [#allocation6], 4294967280 }
   0x5   :  { %16 = sfence }
   0x6   :  { %17 = vsyncpa [#allocation9], 0 }
   0x7   :  { %19 = vsyncpa [#allocation9 + $0x1], 0 }
   0x8   :  { %20 = vsyncpa [#allocation12], 0 }
   0x9   :  { %22 = vsyncpa [#allocation12 + $0x1], 0 }
   0xa   :  { %23 = vsyncpa [#allocation10], 0 }
   0xb   :  { %25 = vsyncpa [#allocation10 + $0x1], 0  ;;  %s1257_s19 = smov 0   ;;  %s1259_s20 = smov 0  }
   0xc   :  { %s1261_s21 = smov 0   ;;  %s1263_s22 = smov 0  }
   0xd   :  { %s1265_s0 = smov 0   ;;  %s1267_s23 = smov 0  }
   0xe LB: > { %s922_s24 = sadd.s32 4294967295, %s1217_s23   ;;  %s923_s25 = sadd.s32 4294967294, %s1217_s23   ;;  %s1217_s23 = sphi %s1267_s23, %s31_s23   ;;  %s1213_s0 = sphi %s1265_s0, %s1500_s0   ;;  %s1209_s22 = sphi %s1263_s22, %s1499_s22   ;;  %s1205_s21 = sphi %s1261_s21, %s1498_s21   ;;  %s1201_s20 = sphi %s1259_s20, %s1497_s20   ;;  %s1197_s19 = sphi %s1257_s19, %s1496_s19  }
   0xf   : > { %s50_s26 = sadd.s32 1, %s1213_s0  ;;  %s59_s27 = sadd.s32 1, %s1205_s21 }
  0x10   : > { %p52_p0 = scmp.ge.s32.totalorder %s50_s26, 2  ;;  %p66_p1 = scmp.ne.s32.totalorder %s1205_s21, %s1201_s20 }
  0x11   : > { %p67_p2 = scmp.eq.s32.totalorder %s1217_s23, 0  ;;  %p72_p3 = scmp.ne.s32.totalorder %s1201_s20, %s1197_s19 }
  0x12   : > { %s1502_s26 = smov (%p52_p0, %s50_s26), 0  ;;  %p73_p5 = scmp.eq.s32.totalorder %s922_s24, 0 }
  0x13   : > { %p1298_p4 = por %p67_p2, %p66_p1  ;;  %s54_s29 = ssub.s32 %s1213_s0, %s1502_s26 }
  0x14   : > { %p154_p6 = scmp.eq.s32.totalorder %s922_s24, 1  ;;  %p57_p7 = scmp.eq.s32.totalorder %s54_s29, 0 }
  0x15   : > { %p1304_p8 = por %p73_p5, %p72_p3  ;;  %p160_p10 = scmp.eq.s32.totalorder %s923_s25, 1 }
  0x16   : > { %p1308_p9 = por %p154_p6, %p66_p1  ;;  %p925_p12 = scmp.ge.s32.totalorder %s1217_s23, 2 }
  0x17   : > { %s1313_s6 = scalar_select %p57_p7, %s1205_s21, %s59_s27  }
  0x18   : > { %p1315_p11 = por %p160_p10, %p72_p3  ;;  %p968_p13 = scmp.lt.s32.totalorder %s1217_s23, 2 }
  0x19   : > { %s180_s8 = sand.u32 1, %s1205_s21   ;;  %s927_s10 = sshll.u32 %s1213_s0, 3 }
  0x1a   : > { %s926_s9 = sshll.u32 %s180_s8, 3  ;;  %s189_s13 = scalar_lea.hbm %s1488_s1, %s927_s10 }
  0x1b   : > { %s184_s14 = scalar_lea.vmem [#allocation8], %s926_s9  ;;  %s191_s16 = sshll.u32 %s189_s13, 4  ;;  %s192_s16 = int_to_ptr.hbm [resolvable:$true] %s191_s16 }
  0x1c   : > { %s193_s15 = sshll.u32 %s184_s14, 4  ;;  %p958_p0 = pnand %p968_p13, %p1298_p4  ;;  %s194_s15 = int_to_ptr.vmem [resolvable:$true] %s193_s15 }
  0x1d   : > { %p930_p1 = scmp.ge.s32.totalorder %s1217_s23, 1  ;;  %p227_p2 = scmp.lt.s32.totalorder %s1217_s23, 3 }
  0x1e   : > { %s181_s17 = scalar_lea.sflag [#allocation9], %s180_s8  ;;  %s209_s25 = scalar_lea.hbm %s1489_s2, %s927_s10 }
  0x1f   : > { %960 = dma.hbm_to_vmem [thread:$0]  (!%p958_p0), %s192_s16, 128, %s194_s15, %s181_s17  }
  0x20   : > { %p228_p3 = pnand %p930_p1, %p227_p2  ;;  %s204_s27 = scalar_lea.vmem [#allocation11], %s926_s9 }
  0x21   : > { %s213_s29 = sshll.u32 %s204_s27, 4  ;;  %s211_s11 = sshll.u32 %s209_s25, 4  ;;  %s214_s29 = int_to_ptr.vmem [resolvable:$true] %s213_s29  ;;  %s212_s11 = int_to_ptr.hbm [resolvable:$true] %s211_s11 }
  0x22   : > { %s201_s12 = scalar_lea.sflag [#allocation12], %s180_s8  ;;  %231 = sbr.rel (%p228_p3) target bundleno = 1114 (0x45a), region = 32 }
  0x23   : > { %963 = dma.hbm_to_vmem [thread:$0]  (!%p958_p0), %s212_s11, 128, %s214_s29, %s201_s12  }
  0x24   : > { %s1334_s28 = sand.u32 (!%p228_p3), 1, %s1201_s20  }
  0x25   : > { %s1337_s13 = sshll.u32 (!%p228_p3), %s1334_s28, 3  ;;  %s234_s14 = scalar_lea.sflag (!%p228_p3), [#allocation9], %s1334_s28 }
  0x26   : > { %s237_s15 = scalar_lea.vmem (!%p228_p3), [#allocation8], %s1337_s13 }
  0x27   : > { %1184 = dma.done.wait (%p1304_p8), %s234_s14, 128  }
  0x28   : > { %1186 = vsyncadd (%p1304_p8), %s234_s14, 4294967168  ;;  %s244_s8 = scalar_lea.sflag [#allocation12], %s1334_s28  ;;  %s247_s9 = scalar_lea.vmem [#allocation11], %s1337_s13 }
  0x29   : > { %1188 = dma.done.wait (%p1304_p8), %s244_s8, 128  }
  0x2a   : > { %1190 = vsyncadd (%p1304_p8), %s244_s8, 4294967168  ;;  %p282_p4 = scmp.lt.s32.totalorder %s1209_s22, 1  ;;  %vm320_vm0 = vcmask 261120   ;;  %v1359_v0 = vld [vmem:[%s247_s9] sm:$0xff]  ;;  %v296_v1 = vld [vmem:[%s237_s15] sm:$0xff]  ;;  %s1220_s30 = smov 96   ;;  %v300_v4 = vlaneseq }
  0x2b   : > { %935 = vmatpush.xpose.msk.msra.mxu0 %vm320_vm0, %v1359_v0  ;;  %v297_v2 = vmul.f32 0.17677669, %v296_v1  ;;  %938 = vmatpush.xpose.msk.msra.mxu2 %vm320_vm0, %v1359_v0  ;;  %s1221_s24 = smov 64   ;;  %s1222_s25 = smov 32   ;;  %vm349_vm2 = vcmask 64512   ;;  %vm292_vm3 = vcmask 31744  }
  0x2c   : > { %s1353_s10 = scalar_select %p282_p4, %s1209_s22, 1  ;;  %504 = vrot.lane.b32.xlu2 %v1359_v0, %s1220_s30  ;;  %v301_v6 = vshrl.u32 %v300_v4, 7  ;;  %v1376_v9 = vand.u32 127, %v300_v4  ;;  %v1223_v18 = vmov -inf   ;;  %v1224_v19 = vmov 0  }
  0x2d   : > { %411 = vrot.lane.b32.xlu1 %v297_v2, %s1220_s30  ;;  %s310_s27 = sld [smem:[#allocation7 + %s1209_s22]]  ;;  %293 = vst.msk [vmem:[#allocation3] sm:$0xff] %vm292_vm3, %v1223_v18  ;;  %1028 = vset.pattern.permute.xlu0 %v1224_v19  ;;  %v1225_v20 = vmov 0.0   ;;  %vm371_vm4 = vcmask 7168   ;;  %v1226_v33 = vmov 1   ;;  %vm458_vm5 = vcmask 15368  }
  0x2e   : > { %s287_s18 = scalar_lea.vmem %s1490_s3, %s1353_s10  ;;  %936 = vmatmul.msk.f32.vlgmr.msra.gmra.mxu0 %vm320_vm0, %v297_v2  ;;  %294 = vst.msk [vmem:[#allocation4] sm:$0xff] %vm292_vm3, %v1225_v20  ;;  %1029 = vset.pattern.permute.xlu2 %v1226_v33  ;;  %v1227_v63 = vmov 2   ;;  %vm553_vm6 = vcmask 23568   ;;  %vm645_vm7 = vcmask 31768   ;;  %vm495_vm8 = vcmask 523520   ;;  %s948_s29 = sshll.u32 %s1209_s22, 3 }
  0x2f   : > { %v1380_v12 = vld [vmem:[%s287_s18] ss:$0 sm:$0xff]  ;;  %295 = vst [vmem:[#allocation5] sm:$0xff] %v1225_v20  ;;  %1030 = vset.pattern.permute.xlu1 %v1227_v63  ;;  %vm593_vm13 = vcmask 785920   ;;  %vm682_vm14 = vcmask 1048320   ;;  %s798_s14 = scalar_lea.hbm %s1491_s4, %s948_s29  ;;  %s281_s15 = scalar_lea.vmem [#allocation13], %s1337_s13 }
  0x30   : > { %s800_s8 = sshll.u32 %s281_s15, 4  ;;  %s802_s9 = sshll.u32 %s798_s14, 4  ;;  %s801_s8 = int_to_ptr.vmem [resolvable:$true] %s800_s8  ;;  %s803_s9 = int_to_ptr.hbm [resolvable:$true] %s802_s9 }
  0x31   : > { %s787_s10 = scalar_lea.sflag [#allocation10], %s1334_s28  ;;  %s1143_s16 = sshra.s32 %s803_s9, 4  ;;  %s1144_s16 = int_to_ptr.hbm [resolvable:$true] %s1143_s16 }
  0x32   : > { %s1145_s17 = scalar_lea.hbm %s1144_s16, 8  ;;  %p1150_p8 = scmp.lt.s32.totalorder %s1144_s16, %s1491_s4 }
  0x33   : > { %v311_v7 = vstv %s310_s27  ;;  %p1146_p5 = scmp.ne.s32.totalorder %s1144_s16, %s1145_s17 }
  0x34   : > { %501 = vrot.lane.b32.xlu2 %v297_v2, %s1221_s24  ;;  %v312_v8 = vadd.s32 %v311_v7, %v301_v6  ;;  %v348_v21 = vld [vmem:[#allocation3] sm:$0xff] }
  0x35   : > { %373 = vrot.lane.b32.xlu1 %v1359_v0, %s1221_s24  ;;  %v365_v51 = vld [vmem:[#allocation4] sm:$0xff]  ;;  %p1147_p6 = pnand %p1146_p5, %p1308_p9 }
  0x36   : > { %v1378_v10 = vadd.s32 4294967288, %v312_v8 }
  0x37   : > { %p1148_p7 = pneg %p1147_p6 }
  0x38   : > { %vm314_vm1 = vcmp.gt.s32.totalorder %v1376_v9, %v1378_v10 }
  0x3d   : > { %598 = vrot.lane.b32.xlu1 %v297_v2, %s1222_s25 }
  0x86   : > { %v505_v3 = vpop.permute.xlu2 %504 }
  0x87   : > { %944 = vmatpush.xpose.msk.msrb.mxu0 %vm320_vm0, %v505_v3 }
  0x8e   : > { %v502_v34 = vpop.permute.xlu2 %501 }
  0x9f   : > { %v412_v5 = vpop.permute.xlu1 %411 }
  0xa0   : > { %939 = vmatmul.msk.f32.vlgmr.msra.gmra.mxu2 %vm320_vm0, %v412_v5 }
  0xa7   : > { %v374_v11 = vpop.permute.xlu1 %373 }
  0xa8   : > { %394 = vmatpush.msra.mxu1 %v374_v11  ;;  %478 = vmatpush.msra.mxu3 %v374_v11 }
  0xaa   : > { %941 = vmatpush.xpose.msk.msrb.mxu1 %vm320_vm0, %v505_v3 }
  0xab   : > { %v344_v13 = vpop.f32.mrf.mxu0 }
  0xac   : > { %v345_v14 = vadd.f32 %v1380_v12, %v344_v13 }
  0xae   : > { %v347_v15 = vsel %vm314_vm1, -10000.0, %v345_v14 }
  0xaf   : > { %v350_v16 = vsel %vm349_vm2, %v347_v15, -inf  ;;  %v599_v17 = vpop.permute.xlu1 %598 }
  0xb0   : > { %351 = vmax.xlane.f32.xlu0 %v350_v16  ;;  %945 = vmatmul.msk.f32.vlgmr.msrb.gmra.mxu0 %vm320_vm0, %v599_v17 }
 0x123   : > { %v432_v22 = vpop.f32.mrf.mxu2  ;;  %v352_v23 = vpop.xlane.xlu0 %351 }
 0x124   : > { %v433_v24 = vadd.f32 %v1380_v12, %v432_v22  ;;  %v353_v25 = vmax.f32 %v348_v21, %v352_v23 }
 0x126   : > { %v354_v26 = vsub.f32 %v348_v21, %v353_v25  ;;  %408 = vst.msk [vmem:[#allocation3] sm:$0xff] %vm371_vm4, %v353_v25  ;;  %359 = vperm.xlu0 %1028, %v353_v25   ;;  %v435_v27 = vsel %vm314_vm1, -10000.0, %v433_v24 }
 0x127   : > { %v437_v28 = vsel %vm349_vm2, %v435_v27, -inf }
 0x128   : > { %438 = vmax.xlane.f32.xlu2 %v437_v28  ;;  %v355_v44 = vmul.f32 1.442695, %v354_v26 }
 0x12d   : > { %v619_v29 = vpop.f32.mrf.mxu0  ;;  %v436_v39 = vld [vmem:[#allocation3] sm:$0xff] }
 0x12e   : > { %v620_v30 = vadd.f32 %v1380_v12, %v619_v29 }
 0x130   : > { %v1402_v31 = vsel %vm314_vm1, -10000.0, %v620_v30 }
 0x131   : > { %v624_v32 = vsel %vm349_vm2, %v1402_v31, -inf }
 0x150   : > { %625 = vmax.xlane.f32.xlu0 %v624_v32 }
 0x198   : > { %v360_v35 = vpop.permute.xlu0 %359 }
 0x199   : > { %v362_v36 = vsub.f32 %v347_v15, %v360_v35 }
 0x19b   : > { %v363_v37 = vmul.f32 1.442695, %v362_v36  ;;  %v439_v38 = vpop.xlane.xlu2 %438 }
 0x19c   : > { %v440_v40 = vmax.f32 %v436_v39, %v439_v38 }
 0x19d   : > { %1039 = vpow2.f32 %v363_v37 }
 0x19e   : > { %v441_v41 = vsub.f32 %v436_v39, %v440_v40  ;;  %497 = vst.msk [vmem:[#allocation3] sm:$0xff] %vm458_vm5, %v440_v40  ;;  %446 = vperm.xlu2 %1029, %v440_v40   ;;  %1041 = vpow2.f32 %v355_v44 }
 0x1a0   : > { %v442_v10 = vmul.f32 1.442695, %v441_v41 }
 0x1a3   : > { %v1040_v42 = vpop.eup %1039 }
 0x1a4   : > { %937 = vmatmul.msk.f32.vlgmr.msra.gmra.mxu1 %vm349_vm2, %v1040_v42  ;;  %v367_v43 = vsel %vm349_vm2, %v1040_v42, 0.0  ;;  %v1042_v45 = vpop.eup %1041 }
 0x1a5   : > { %368 = vadd.xlane.f32.xlu0 %v367_v43  ;;  %v366_v52 = vmul.f32 %v1042_v45, %v365_v51  ;;  %v531_v2 = vld [vmem:[#allocation3] sm:$0xff] }
 0x1a6   : > { %555 = vrot.lane.b32.xlu2 %v1359_v0, %s1222_s25  ;;  %v1228_v0 = vmov 3  }
 0x1a7   : > { %1031 = vset.pattern.permute.xlu2 %v1228_v0 }
 0x1ac   : > { %942 = vmatmul.msk.f32.vlgmr.msrb.gmra.mxu1 %vm320_vm0, %v502_v34 }
 0x1b9   : > { %402 = vperm.xlu0 %1028, %v1042_v45  }
 0x1c1   : > { %1037 = vset.pattern.permute.xlu0 %v1228_v0 }
 0x1c3   : > { %v626_v50 = vpop.xlane.xlu0 %625 }
 0x1f8   : > { %v447_v46 = vpop.permute.xlu2 %446 }
 0x1f9   : > { %v449_v47 = vsub.f32 %v435_v27, %v447_v46 }
 0x1fb   : > { %v450_v48 = vmul.f32 1.442695, %v449_v47 }
 0x1fd   : > { %1043 = vpow2.f32 %v450_v48 }
 0x1fe   : > { %1045 = vpow2.f32 %v442_v10 }
 0x200   : > { %v556_v9 = vpop.permute.xlu2 %555 }
 0x201   : > { %665 = vmatpush.msrb.mxu2 %v556_v9  ;;  %576 = vmatpush.msrb.mxu3 %v556_v9 }
 0x203   : > { %v1044_v49 = vpop.eup %1043 }
 0x204   : > { %940 = vmatmul.msk.f32.vlgmr.msra.gmra.mxu3 %vm349_vm2, %v1044_v49  ;;  %v454_v8 = vsel %vm349_vm2, %v1044_v49, 0.0 }
 0x218   : > { %v369_v53 = vpop.xlane.xlu0 %368 }
 0x219   : > { %v370_v54 = vadd.f32 %v369_v53, %v366_v52 }
 0x21b   : > { %372 = vst.msk [vmem:[#allocation4] sm:$0xff] %vm371_vm4, %v370_v54 }
 0x221   : > { %v396_v55 = vpop.f32.mrf.mxu1 }
 0x222   : > { %v452_v27 = vld [vmem:[#allocation4] sm:$0xff] }
 0x229   : > { %v527_v56 = vpop.f32.mrf.mxu1 }
 0x22a   : > { %v528_v57 = vadd.f32 %v1380_v12, %v527_v56  ;;  %v1046_v12 = vpop.eup %1045 }
 0x22b   : > { %v403_v58 = vpop.permute.xlu0 %402  ;;  %v453_v28 = vmul.f32 %v1046_v12, %v452_v27 }
 0x22c   : > { %v405_v59 = vmul.f32 0.0, %v403_v58  ;;  %v530_v60 = vsel %vm314_vm1, -10000.0, %v528_v57 }
 0x22d   : > { %v532_v61 = vsel %vm349_vm2, %v530_v60, -inf }
 0x22e   : > { %v406_v62 = vadd.f32 %v405_v59, %v396_v55  ;;  %533 = vmax.xlane.f32.xlu1 %v532_v61 }
 0x230   : > { %407 = vst.msk [vmem:[#allocation5] sm:$0xff] %vm320_vm0, %v406_v62 }
 0x237   : > { %v483_v38 = vld [vmem:[#allocation5] sm:$0xff] }
 0x287   : > { %v480_v26 = vpop.f32.mrf.mxu3 }
 0x2a1   : > { %v534_v1 = vpop.xlane.xlu1 %533 }
 0x2a2   : > { %v535_v3 = vmax.f32 %v531_v2, %v534_v1 }
 0x2a4   : > { %v536_v4 = vsub.f32 %v531_v2, %v535_v3  ;;  %595 = vst.msk [vmem:[#allocation3] sm:$0xff] %vm553_vm6, %v535_v3  ;;  %541 = vperm.xlu1 %1030, %v535_v3  }
 0x2a6   : > { %v537_v11 = vmul.f32 1.442695, %v536_v4 }
 0x2a8   : > { %1047 = vpow2.f32 %v537_v11 }
 0x2ab   : > { %v623_v5 = vld [vmem:[#allocation3] sm:$0xff] }
 0x2ac   : > { %v627_v6 = vmax.f32 %v623_v5, %v626_v50  ;;  %1032 = vset.pattern.permute.xlu1 %v1226_v33 }
 0x2ae   : > { %633 = vperm.xlu2 %1031, %v627_v6   ;;  %v628_v7 = vsub.f32 %v623_v5, %v627_v6  ;;  %684 = vst.msk [vmem:[#allocation3] sm:$0xff] %vm645_vm7, %v627_v6  ;;  %v1048_v13 = vpop.eup %1047 }
 0x2b0   : > { %v629_v25 = vmul.f32 1.442695, %v628_v7 }
 0x2ce   : > { %455 = vadd.xlane.f32.xlu1 %v454_v8 }
 0x2e7   : > { %486 = vperm.xlu1 %1032, %v1046_v12  }
 0x2ef   : > { %1033 = vset.pattern.permute.xlu1 %v1227_v63 }
 0x2f0   : > { %584 = vperm.xlu1 %1033, %v1048_v13  }
 0x2f8   : > { %1035 = vset.pattern.permute.xlu1 %v1226_v33 }
 0x308   : > { %v634_v14 = vpop.permute.xlu2 %633 }
 0x309   : > { %v636_v15 = vsub.f32 %v1402_v31, %v634_v14 }
 0x30b   : > { %v637_v16 = vmul.f32 1.442695, %v636_v15 }
 0x30d   : > { %1049 = vpow2.f32 %v637_v16 }
 0x313   : > { %v1050_v17 = vpop.eup %1049 }
 0x314   : > { %946 = vmatmul.msk.f32.vlgmr.msrb.gmra.mxu2 %vm349_vm2, %v1050_v17  ;;  %v641_v18 = vsel %vm349_vm2, %v1050_v17, 0.0 }
 0x315   : > { %642 = vadd.xlane.f32.xlu0 %v641_v18 }
 0x316   : > { %v542_v20 = vpop.permute.xlu1 %541 }
 0x317   : > { %v544_v21 = vsub.f32 %v530_v60, %v542_v20 }
 0x319   : > { %v545_v22 = vmul.f32 1.442695, %v544_v21 }
 0x31b   : > { %1051 = vpow2.f32 %v545_v22 }
 0x31c   : > { %1053 = vpow2.f32 %v629_v25 }
 0x321   : > { %v1052_v23 = vpop.eup %1051 }
 0x322   : > { %943 = vmatmul.msk.f32.vlgmr.msrb.gmra.mxu3 %vm349_vm2, %v1052_v23  ;;  %v549_v24 = vsel %vm349_vm2, %v1052_v23, 0.0  ;;  %v1054_v30 = vpop.eup %1053 }
 0x323   : > { %550 = vadd.xlane.f32.xlu2 %v549_v24 }
 0x33b   : > { %491 = vrot.lane.b32.xlu2 %v480_v26, %s1222_s25 }
 0x341   : > { %v456_v29 = vpop.xlane.xlu1 %455 }
 0x342   : > { %v457_v31 = vadd.f32 %v456_v29, %v453_v28 }
 0x343   : > { %673 = vperm.xlu2 %1031, %v1054_v30  }
 0x344   : > { %459 = vst.msk [vmem:[#allocation4] sm:$0xff] %vm458_vm5, %v457_v31 }
 0x34b   : > { %1034 = vset.pattern.permute.xlu2 %v1224_v19  ;;  %v547_v32 = vld [vmem:[#allocation4] sm:$0xff] }
 0x34c   : > { %v548_v33 = vmul.f32 %v1048_v13, %v547_v32 }
 0x359   : > { %v487_v37 = vpop.permute.xlu1 %486 }
 0x35a   : > { %v489_v39 = vmul.f32 %v487_v37, %v483_v38 }
 0x362   : > { %v585_v58 = vpop.permute.xlu1 %584 }
 0x388   : > { %v643_v19 = vpop.xlane.xlu0 %642 }
 0x396   : > { %v551_v34 = vpop.xlane.xlu2 %550 }
 0x397   : > { %v552_v35 = vadd.f32 %v551_v34, %v548_v33  ;;  %v667_v36 = vpop.f32.mrf.mxu2 }
 0x398   : > { %678 = vrot.lane.b32.xlu1 %v667_v36, %s1220_s30  ;;  %s1149_s30 = scalar_lea.hbm %s1491_s4, 16 }
 0x399   : > { %554 = vst.msk [vmem:[#allocation4] sm:$0xff] %vm553_vm6, %v552_v35  ;;  %p1151_p10 = scmp.lt.s32.totalorder %s1149_s30, %s1145_s17 }
 0x39b   : > { %p1152_p13 = por %p1151_p10, %p1150_p8 }
 0x39d   : > { %p1153_p0 = pnand %p1152_p13, %p1148_p7 }
 0x39e   : > { %v492_v40 = vpop.permute.xlu2 %491 }
 0x39f   : > { %v494_v41 = vadd.f32 %v492_v40, %v489_v39 }
 0x3a0   : > { %v639_v42 = vld [vmem:[#allocation4] sm:$0xff] }
 0x3a1   : > { %v640_v43 = vmul.f32 %v1054_v30, %v639_v42  ;;  %496 = vst.msk [vmem:[#allocation5] sm:$0xff] %vm495_vm8, %v494_v41 }
 0x3a3   : > { %v644_v44 = vadd.f32 %v643_v19, %v640_v43 }
 0x3a5   : > { %646 = vst.msk [vmem:[#allocation4] sm:$0xff] %vm645_vm7, %v644_v44  ;;  %v578_v45 = vpop.f32.mrf.mxu3 }
 0x3a6   : > { %589 = vrot.lane.b32.xlu0 %v578_v45, %s1221_s24  ;;  %v674_v62 = vpop.permute.xlu2 %673 }
 0x3a8   : > { %v581_v57 = vld [vmem:[#allocation5] sm:$0xff] }
 0x3a9   : > { %v587_v59 = vmul.f32 %v585_v58, %v581_v57 }
 0x3ac   : > { %v760_v46 = vld [vmem:[#allocation4] sm:$0xff] }
 0x3ad   : > { %1055 = vrcp.f32 %v760_v46  ;;  %v772_v50 = vand.u32 2147483648, %v760_v46  ;;  %v770_v52 = vand.u32 2147483647, %v760_v46  ;;  %vm766_vm10 = vweird.f32 %v760_v46 }
 0x3af   : > { %v773_v54 = vor.u32 1.1754944e-38, %v772_v50  ;;  %vm771_vm12 = vcmp.eq.f32.partialorder %v770_v52, 8.507059e+37 }
 0x3b3   : > { %v1056_v47 = vpop.eup %1055 }
 0x3b4   : > { %v762_v48 = vmul.f32 %v1056_v47, %v760_v46  ;;  %vm767_vm9 = vweird.f32 %v1056_v47 }
 0x3b5   : > { %vm768_vm11 = vmor %vm766_vm10, %vm767_vm9 }
 0x3b6   : > { %v763_v49 = vsub.f32 1.0, %v762_v48 }
 0x3b8   : > { %v764_v51 = vmul.f32 %v1056_v47, %v763_v49 }
 0x3ba   : > { %v765_v53 = vadd.f32 %v1056_v47, %v764_v51 }
 0x3bc   : > { %v769_v55 = vsel %vm768_vm11, %v1056_v47, %v765_v53 }
 0x3bd   : > { %v774_v56 = vsel %vm771_vm12, %v773_v54, %v769_v55 }
 0x3be   : > { %779 = vperm.xlu0 %1037, %v774_v56   ;;  %731 = vperm.xlu1 %1035, %v774_v56  }
 0x3bf   : > { %707 = vperm.xlu2 %1034, %v774_v56  }
 0x3c7   : > { %1036 = vset.pattern.permute.xlu2 %v1227_v63 }
 0x3c8   : > { %755 = vperm.xlu2 %1036, %v774_v56  }
 0x40a   : > { %v679_v2 = vpop.permute.xlu1 %678 }
 0x418   : > { %v590_v60 = vpop.permute.xlu0 %589 }
 0x419   : > { %v592_v61 = vadd.f32 %v590_v60, %v587_v59  ;;  %v708_v63 = vpop.permute.xlu2 %707 }
 0x41b   : > { %594 = vst.msk [vmem:[#allocation5] sm:$0xff] %vm593_vm13, %v592_v61 }
 0x422   : > { %v670_v0 = vld [vmem:[#allocation5] sm:$0xff]  ;;  %v756_v9 = vpop.permute.xlu2 %755 }
 0x423   : > { %v676_v1 = vmul.f32 %v674_v62, %v670_v0 }
 0x425   : > { %v681_v3 = vadd.f32 %v679_v2, %v676_v1 }
 0x427   : > { %683 = vst.msk [vmem:[#allocation5] sm:$0xff] %vm682_vm14, %v681_v3 }
 0x42e   : > { %v704_v4 = vld [vmem:[#allocation5] sm:$0xff] }
 0x42f   : > { %v710_v5 = vmul.f32 %v708_v63, %v704_v4 }
 0x430   : > { %v732_v6 = vpop.permute.xlu1 %731  ;;  %v780_v12 = vpop.permute.xlu0 %779 }
 0x431   : > { %711 = vst.msk [vmem:[#allocation5] sm:$0xff] %vm320_vm0, %v710_v5 }
 0x438   : > { %v728_v7 = vld [vmem:[#allocation5] sm:$0xff] }
 0x439   : > { %v734_v8 = vmul.f32 %v732_v6, %v728_v7 }
 0x43b   : > { %735 = vst.msk [vmem:[#allocation5] sm:$0xff] %vm495_vm8, %v734_v8 }
 0x442   : > { %v752_v10 = vld [vmem:[#allocation5] sm:$0xff] }
 0x443   : > { %v758_v11 = vmul.f32 %v756_v9, %v752_v10 }
 0x445   : > { %759 = vst.msk [vmem:[#allocation5] sm:$0xff] %vm593_vm13, %v758_v11 }
 0x44c   : > { %v776_v13 = vld [vmem:[#allocation5] sm:$0xff] }
 0x44d   : > { %v782_v14 = vmul.f32 %v780_v12, %v776_v13 }
 0x44f   : > { %783 = vst.msk [vmem:[#allocation5] sm:$0xff] %vm682_vm14, %v782_v14 }
 0x456   : > { %v784_v15 = vld [vmem:[#allocation5] sm:$0xff] }
 0x457   : > { %785 = vst [vmem:[%s281_s15] sm:$0xff] %v784_v15 }
 0x458   : > { %1156 = shalt.err (!%p1153_p0)
}
 0x459   : > { %955 = dma.vmem_to_hbm [thread:$0]  (%p1308_p9), %s801_s8, 128, %s803_s9, %s787_s10  }
 0x45a PF: > { %s814_s28 = sand.u32 1, %s1197_s19   ;;  %p965_p1 = pnand %p925_p12, %p1315_p11 }
 0x45b   : > { %s815_s25 = scalar_lea.sflag [#allocation10], %s814_s28 }
 0x45c   : > { %p966_p2 = pneg %p965_p1 }
 0x45e   : > { %1192 = dma.done.wait (%p966_p2), %s815_s25, 128  }
 0x45f   : > { %1194 = vsyncadd (%p966_p2), %s815_s25, 4294967168  ;;  %s31_s23 = sadd.s32 1, %s1217_s23   ;;  %s1496_s19 = smov %s1201_s20 }
 0x460   : > { %p28_p3 = scmp.ge.s32.totalorder %s31_s23, 4   ;;  %s1497_s20 = smov %s1205_s21 }
 0x461   : > { %s1498_s21 = smov %s1313_s6  ;;  %s1499_s22 = smov %s1213_s0 }
 0x462   : > { %s1500_s0 = smov %s1502_s26  ;;  %30 = sbr.rel (!%p28_p3) target bundleno = 14 (0xe), region = 101 }
 0x467   :  { %821 = vsyncpa [#allocation9], 1 }
 0x468   :  { %823 = vsyncpa [#allocation9 + $0x1], 1 }
 0x469   :  { %824 = vsyncpa [#allocation12], 1 }
 0x46a   :  { %826 = vsyncpa [#allocation12 + $0x1], 1 }
 0x46b   :  { %827 = vsyncpa [#allocation10], 1 }
 0x46c   :  { %829 = vsyncpa [#allocation10 + $0x1], 1 }

</bundles_post_ra>
